<compile_context>
chip_gen: v7x
topology: tpu7x:2x2x1
jax: 0.10.0
libtpu: 0.0.40
codegen_flags: <defaults>
</compile_context>

<pallas_src>
import functools

import jax
import jax.numpy as jnp
from jax.experimental import pallas as pl
from jax.experimental.pallas import tpu as pltpu


def _pow_static(base, log_base, gamma):
    """base ** gamma for a *static* gamma, minimizing EUP (transcendental) traffic."""
    if float(gamma) == int(gamma) and int(gamma) >= 0:
        return base ** int(gamma)                      # integer_pow -> pure VPU multiplies
    return jnp.exp(jnp.float32(gamma) * log_base)      # one EUP exp, reuses existing log


def _amm_loss_kernel(x_ref, t_ref, out_ref, acc_ref, *,
                     gamma, alpha, n_valid, tile_n, needs_mask):
    # x_ref: (C, tile_n) logits tile (lane-dense), t_ref: (1, tile_n) targets tile
    i = pl.program_id(0)

    @pl.when(i == 0)
    def _():
        acc_ref[0, 0] = jnp.float32(0.0)

    x = x_ref[...].astype(jnp.float32)                 # cast at tile load (v5e has no bf16 VPU)
    t = t_ref[...].astype(jnp.float32)

    # Numerically stable log-softmax along the class (sublane) axis.
    m = jnp.max(x, axis=0, keepdims=True)              # (1, tile_n)
    e = jnp.exp(x - m)                                 # (C, tile_n)
    denom = jnp.sum(e, axis=0, keepdims=True)          # (1, tile_n)
    log_denom = jnp.log(denom)

    x1 = x[1:2, :]                                     # logits of class 1
    e1 = e[1:2, :]
    log_p = x1 - m - log_denom                         # log softmax(x)[1]
    log_1mp = jnp.log(denom - e1) - log_denom          # log(1 - p)
    p = jnp.exp(log_p)
    one_m_p = 1.0 - p

    pow_1mp = _pow_static(one_m_p, log_1mp, gamma)
    pow_p = _pow_static(p, log_p, gamma)

    a = jnp.float32(alpha)
    # Same formula as the PyTorch module (0 * -inf -> NaN semantics preserved).
    loss = (-a * pow_1mp * (t * log_p)
            - (1.0 - a) * pow_p * ((1.0 - t) * log_1mp))

    if needs_mask:  # static flag: only emitted when N % tile_n != 0
        col = i * tile_n + jax.lax.broadcasted_iota(jnp.int32, (1, tile_n), 1)
        loss = jnp.where(col < n_valid, loss, 0.0)

    # Accumulate this tile's contribution to the mean.
    acc_ref[0, 0] += jnp.sum(loss) * jnp.float32(1.0 / n_valid)

    @pl.when(i == pl.num_programs(0) - 1)
    def _():
        out_ref[0, 0] = acc_ref[0, 0]


def amm_loss(logits, target, gamma=2, alpha=0.25, tile_n=64 * 1024):
    """Pallas TPU AmmLoss.forward.  logits: (N, C) float, target: (N,) 0/1 labels."""
    N, C = logits.shape
    if C < 2:
        raise ValueError("AmmLoss uses class index 1; need C >= 2")

    # Lane-dense presentation: classes on sublanes, samples on lanes. Native dtype kept.
    xt = jnp.transpose(logits)                         # (C, N)
    t2d = target.reshape(1, N)                         # (1, N)

    if N <= tile_n:
        tn = N                                         # single tile == full array dims
    else:
        tn = tile_n                                    # must be a multiple of 128
    n_tiles = pl.cdiv(N, tn)
    needs_mask = (N % tn) != 0

    kernel = functools.partial(
        _amm_loss_kernel, gamma=gamma, alpha=alpha,
        n_valid=N, tile_n=tn, needs_mask=needs_mask)

    out = pl.pallas_call(
        kernel,
        out_shape=jax.ShapeDtypeStruct((1, 1), jnp.float32),
        grid_spec=pltpu.PrefetchScalarGridSpec(
            num_scalar_prefetch=0,
            grid=(n_tiles,),
            in_specs=[
                pl.BlockSpec((C, tn), lambda i: (0, i)),   # lane-dense logits tile
                pl.BlockSpec((1, tn), lambda i: (0, i)),   # lane-dense target tile
            ],
            out_specs=pl.BlockSpec((1, 1), lambda i: (0, 0),
                                   memory_space=pltpu.MemorySpace.SMEM),
            scratch_shapes=[pltpu.SMEM((1, 1), jnp.float32)],
        ),
        compiler_params=pltpu.CompilerParams(
            # Single reduction axis -> "arbitrary".  (A 2-D ("parallel","arbitrary")
            # grid with per-core partial sums would add v7x megacore sharding.)
            dimension_semantics=("arbitrary",),
            vmem_limit_bytes=32 * 1024 * 1024,
        ),
    )(xt, t2d)
    return out[0, 0]


if __name__ == "__main__":
    key = jax.random.PRNGKey(0)
    k1, k2, k3, k4 = jax.random.split(key, 4)

    def reference(logits, target, gamma=2, alpha=0.25):
        pt = jax.nn.softmax(logits.astype(jnp.float32), axis=1)
        p = pt[:, 1]
        t = target.astype(jnp.float32)
        return jnp.mean(-alpha * (1 - p) ** gamma * (t * jnp.log(p))
                        - (1 - alpha) * p ** gamma * ((1 - t) * jnp.log(1 - p)))

    # 1) small f32 case (single tile)
    N, C = 128, 4
    logits = jax.random.normal(k1, (N, C), dtype=jnp.float32)
    target = jax.random.bernoulli(k2, 0.5, (N,)).astype(jnp.float32)
    loss = amm_loss(logits, target)
    jax.block_until_ready(loss)
    assert jnp.allclose(loss, reference(logits, target), rtol=1e-5, atol=1e-6), \
        (loss, reference(logits, target))

    # 2) multi-tile path with a ragged last tile (exercises grid + accumulator + mask)
    N2 = 640
    logits2 = jax.random.normal(k3, (N2, C), dtype=jnp.float32)
    target2 = jax.random.bernoulli(k4, 0.5, (N2,)).astype(jnp.float32)
    loss2 = amm_loss(logits2, target2, tile_n=256)
    jax.block_until_ready(loss2)
    assert jnp.allclose(loss2, reference(logits2, target2), rtol=1e-5, atol=1e-6), \
        (loss2, reference(logits2, target2))

    # 3) bf16 logits go straight into the kernel (no wrapper-side f32 cast)
    logits_bf16 = logits.astype(jnp.bfloat16)
    loss3 = amm_loss(logits_bf16, target)
    jax.block_until_ready(loss3)
    ref3 = reference(logits_bf16, target)
    assert jnp.allclose(loss3, ref3, rtol=1e-4, atol=1e-5), (loss3, ref3)

    print("KERNEL_OK")
</pallas_src>

<mosaic_0001>
module attributes {stable_mosaic.version = 11 : i64} {
  func.func @_amm_loss_kernel(%arg0: i32, %arg1: memref<4x128xf32, #tpu.memory_space<vmem>>, %arg2: memref<1x128xf32, #tpu.memory_space<vmem>>, %arg3: memref<1x1xf32, #tpu.memory_space<smem>>, %arg4: memref<1x1xf32, #tpu.memory_space<smem>>) attributes {dimension_semantics = [#tpu.dimension_semantics<arbitrary>], iteration_bounds = array<i64: 1>, scalar_prefetch = 0 : i64, scratch_operands = 1 : i64, tpu.core_type = #tpu.core_type<tc>, window_params = [{transform_indices = @transform_0, window_bounds = array<i64: 4, 128>}, {transform_indices = @transform_1, window_bounds = array<i64: 1, 128>}, {transform_indices = @transform_2, window_bounds = array<i64: 1, 1>}]} {
    %c0_i32 = arith.constant 0 : i32
    %0 = arith.cmpi eq, %arg0, %c0_i32 : i32
    %1 = arith.extui %0 : i1 to i32
    %c0_i32_0 = arith.constant 0 : i32
    %2 = arith.cmpi ne, %1, %c0_i32_0 : i32
    scf.if %2 {
      %cst_19 = arith.constant 0.000000e+00 : f32
      %c0_20 = arith.constant 0 : index
      %c0_21 = arith.constant 0 : index
      %49 = memref.load %arg4[%c0_20, %c0_21] : memref<1x1xf32, #tpu.memory_space<smem>>
      memref.store %cst_19, %arg4[%c0_20, %c0_21] : memref<1x1xf32, #tpu.memory_space<smem>>
    } else {
    }
    %c0 = arith.constant 0 : index
    %c0_1 = arith.constant 0 : index
    %3 = vector.load %arg1[%c0, %c0_1] : memref<4x128xf32, #tpu.memory_space<vmem>>, vector<4x128xf32>
    %c0_2 = arith.constant 0 : index
    %c0_3 = arith.constant 0 : index
    %4 = vector.load %arg2[%c0_2, %c0_3] : memref<1x128xf32, #tpu.memory_space<vmem>>, vector<1x128xf32>
    %cst = arith.constant dense<0xFF800000> : vector<128xf32>
    %5 = vector.multi_reduction <maximumf>, %3, %cst [0] : vector<4x128xf32> to vector<128xf32>
    %6 = vector.shape_cast %5 : vector<128xf32> to vector<1x128xf32>
    %7 = vector.broadcast %6 : vector<1x128xf32> to vector<4x128xf32>
    %8 = arith.subf %3, %7 : vector<4x128xf32>
    %9 = math.exp %8 : vector<4x128xf32>
    %cst_4 = arith.constant dense<0.000000e+00> : vector<128xf32>
    %10 = vector.multi_reduction <add>, %9, %cst_4 [0] : vector<4x128xf32> to vector<128xf32>
    %11 = vector.shape_cast %10 : vector<128xf32> to vector<1x128xf32>
    %12 = math.log %11 : vector<1x128xf32>
    %13 = vector.extract_strided_slice %3 {offsets = [1, 0], sizes = [1, 128], strides = [1, 1]} : vector<4x128xf32> to vector<1x128xf32>
    %14 = vector.extract_strided_slice %9 {offsets = [1, 0], sizes = [1, 128], strides = [1, 1]} : vector<4x128xf32> to vector<1x128xf32>
    %15 = arith.subf %13, %6 : vector<1x128xf32>
    %16 = arith.subf %15, %12 : vector<1x128xf32>
    %17 = arith.subf %11, %14 : vector<1x128xf32>
    %18 = math.log %17 : vector<1x128xf32>
    %19 = arith.subf %18, %12 : vector<1x128xf32>
    %20 = math.exp %16 : vector<1x128xf32>
    %cst_5 = arith.constant 1.000000e+00 : f32
    %21 = vector.broadcast %cst_5 : f32 to vector<1x128xf32>
    %22 = arith.subf %21, %20 : vector<1x128xf32>
    %23 = arith.mulf %22, %22 : vector<1x128xf32>
    %24 = arith.mulf %20, %20 : vector<1x128xf32>
    %cst_6 = arith.constant 0.000000e+00 : f32
    %cst_7 = arith.constant 2.500000e-01 : f32
    %25 = arith.subf %cst_6, %cst_7 : f32
    %26 = vector.broadcast %25 : f32 to vector<1x128xf32>
    %27 = arith.mulf %26, %23 : vector<1x128xf32>
    %28 = arith.mulf %4, %16 : vector<1x128xf32>
    %29 = arith.mulf %27, %28 : vector<1x128xf32>
    %cst_8 = arith.constant 1.000000e+00 : f32
    %cst_9 = arith.constant 2.500000e-01 : f32
    %30 = arith.subf %cst_8, %cst_9 : f32
    %31 = vector.broadcast %30 : f32 to vector<1x128xf32>
    %32 = arith.mulf %31, %24 : vector<1x128xf32>
    %cst_10 = arith.constant 1.000000e+00 : f32
    %33 = vector.broadcast %cst_10 : f32 to vector<1x128xf32>
    %34 = arith.subf %33, %4 : vector<1x128xf32>
    %35 = arith.mulf %34, %19 : vector<1x128xf32>
    %36 = arith.mulf %32, %35 : vector<1x128xf32>
    %37 = arith.subf %29, %36 : vector<1x128xf32>
    %c0_11 = arith.constant 0 : index
    %c0_12 = arith.constant 0 : index
    %38 = memref.load %arg4[%c0_11, %c0_12] : memref<1x1xf32, #tpu.memory_space<smem>>
    %39 = vector.shape_cast %37 : vector<1x128xf32> to vector<1x1x128xf32>
    %cst_13 = arith.constant dense<0.000000e+00> : vector<1xf32>
    %40 = vector.multi_reduction <add>, %39, %cst_13 [1, 2] : vector<1x1x128xf32> to vector<1xf32>
    %41 = vector.shape_cast %40 : vector<1xf32> to vector<1x1x1xf32>
    %42 = vector.extract %41[0, 0, 0] : f32 from vector<1x1x1xf32>
    %cst_14 = arith.constant 7.812500e-03 : f32
    %43 = arith.mulf %42, %cst_14 : f32
    %44 = arith.addf %38, %43 : f32
    %c0_15 = arith.constant 0 : index
    %c0_16 = arith.constant 0 : index
    %45 = memref.load %arg4[%c0_15, %c0_16] : memref<1x1xf32, #tpu.memory_space<smem>>
    memref.store %44, %arg4[%c0_15, %c0_16] : memref<1x1xf32, #tpu.memory_space<smem>>
    %c0_i32_17 = arith.constant 0 : i32
    %46 = arith.cmpi eq, %arg0, %c0_i32_17 : i32
    %47 = arith.extui %46 : i1 to i32
    %c0_i32_18 = arith.constant 0 : i32
    %48 = arith.cmpi ne, %47, %c0_i32_18 : i32
    scf.if %48 {
      %c0_19 = arith.constant 0 : index
      %c0_20 = arith.constant 0 : index
      %49 = memref.load %arg4[%c0_19, %c0_20] : memref<1x1xf32, #tpu.memory_space<smem>>
      %c0_21 = arith.constant 0 : index
      %c0_22 = arith.constant 0 : index
      %50 = memref.load %arg3[%c0_21, %c0_22] : memref<1x1xf32, #tpu.memory_space<smem>>
      memref.store %49, %arg3[%c0_21, %c0_22] : memref<1x1xf32, #tpu.memory_space<smem>>
    } else {
    }
    return
  }
  func.func @transform_0(%arg0: i32) -> (i32, i32) {
    %c0_i32 = arith.constant 0 : i32
    %c0_i32_0 = arith.constant 0 : i32
    return %c0_i32, %arg0 : i32, i32
  }
  func.func @transform_1(%arg0: i32) -> (i32, i32) {
    %c0_i32 = arith.constant 0 : i32
    %c0_i32_0 = arith.constant 0 : i32
    return %c0_i32, %arg0 : i32, i32
  }
  func.func @transform_2(%arg0: i32) -> (i32, i32) {
    %c0_i32 = arith.constant 0 : i32
    %c0_i32_0 = arith.constant 0 : i32
    %c0_i32_1 = arith.constant 0 : i32
    return %c0_i32, %c0_i32_0 : i32, i32
  }
}

</mosaic_0001>

<bundles_post_ra>
// kernel: tpu_custom_call.1
= control target key start
LH: loop header
LB: loop body
LE: loop exit
PB: predicated region body
PF: predicated region fallthrough
CT: control target
= control target key end

     0   :  { %7 = vsyncpa [#allocation4], 0  ;;  %s249_s0 = inlined_call_operand.hbm [shape: f32[4,128], index: 0, kind: input, shape index: {}]   ;;  %s250_s1 = inlined_call_operand.vmem [shape: f32[1,128], index: 1, kind: input, shape index: {}]   ;;  %s251_s2 = inlined_call_operand.hbm [shape: f32[1,1], index: 2, kind: output, shape index: {}]  }
   0x1   :  { %8 = vsyncpa [#allocation5], 0  ;;  %s204_s9 = smov [#allocation3]   ;;  %s168_s13 = scalar_lea.hbm %s249_s0, 64 }
   0x2   :  { %s15_s10 = sshll.u32 %s204_s9, 4  ;;  %p169_p0 = scmp.ne.s32.totalorder %s249_s0, %s168_s13  ;;  %s16_s10 = int_to_ptr.vmem [resolvable:$true] %s15_s10 }
   0x3   :  { %p172_p1 = scmp.lt.u32.totalorder %s168_s13, %s249_s0 }
   0x5   :  { %p174_p2 = pnand %p172_p1, %p169_p0 }
   0x7   :  { %177 = shalt.err (!%p174_p2)
}
   0x8   :  { %s178_s18 = scalar_lea.vmem %s16_s10, 64  ;;  %p183_p4 = scmp.lt.s32.totalorder %s16_s10, %s16_s10 }
   0x9   :  { %p179_p3 = scmp.ne.s32.totalorder %s16_s10, %s178_s18  ;;  %p184_p5 = scmp.lt.s32.totalorder %s178_s18, %s178_s18 }
   0xb   :  { %p185_p6 = por %p184_p5, %p183_p4 }
   0xd   :  { %p186_p7 = pnand %p185_p6, %p179_p3 }
   0xf   :  { %189 = shalt.err (!%p186_p7)
}
  0x10   :  { %18 = dma.hbm_to_vmem [thread:$0]  %s249_s0, 64, %s16_s10, [#allocation4]  }
  0x11   :  { %200 = dma.done.wait [#allocation4], 64  }
  0x12   :  { %201 = vsyncadd [#allocation4], 4294967232  ;;  %vm32_vm0 = vcmask 1043456   ;;  %v30_v0 = vld [vmem:[#allocation3] sm:$0xf]  ;;  %v67_v21 = vlaneseq  ;;  %vm120_vm1 = vcmask 1040384  }
  0x13   :  { %v33_v1 = vsel %vm32_vm0, %v30_v0, -inf  ;;  %v205_v19 = vmov 1966171168   ;;  %v31_v33 = vld [vmem:[%s250_s1] sm:$0x1]  ;;  %s190_s25 = scalar_lea.hbm %s251_s2, 16 }
  0x14   :  { %v34_v2 = vrot.slane %v33_v1, 4  ;;  %v65_v20 = vunpack.c.l.s4 %v205_v19  ;;  %v68_v23 = vshrl.u32 %v67_v21, 7  ;;  %v89_v37 = vsub.f32 1.0, %v31_v33  ;;  %p191_p8 = scmp.ne.s32.totalorder %s251_s2, %s190_s25  ;;  %p194_p9 = scmp.lt.u32.totalorder %s190_s25, %s251_s2 }
  0x16   :  { %v35_v3 = vmax.f32 %v33_v1, %v34_v2  ;;  %v66_v22 = vunpack.c.0.s8 %v65_v20  ;;  %v84_v40 = vsub.s32 0, %v68_v23  ;;  %p196_p10 = pnand %p194_p9, %p191_p8 }
  0x18   :  { %v36_v4 = vrot.slane %v35_v3, 2  ;;  %v69_v26 = vsub.s32 %v66_v22, %v68_v23 }
  0x1a   :  { %v37_v5 = vmax.f32 %v35_v3, %v36_v4 }
  0x1c   :  { %v38_v6 = vrot.slane %v37_v5, 1 }
  0x1e   :  { %v39_v7 = vmax.f32 %v37_v5, %v38_v6 }
  0x20   :  { %v40_v8 = vsub.f32 %v30_v0, %v39_v7 }
  0x22   :  { %v41_v9 = vmul.f32 1.442695, %v40_v8 }
  0x24   :  { %160 = vpow2.f32 %v41_v9 }
  0x2e   :  { %v161_v10 = vpop.eup %160 }
  0x2f   :  { %v43_v11 = vsel %vm32_vm0, %v161_v10, 0.0 }
  0x30   :  { %v44_v12 = vrot.slane %v43_v11, 4 }
  0x32   :  { %v45_v13 = vadd.f32 %v44_v12, %v43_v11 }
  0x34   :  { %v46_v14 = vrot.slane %v45_v13, 2 }
  0x36   :  { %v47_v15 = vadd.f32 %v46_v14, %v45_v13 }
  0x38   :  { %v48_v16 = vrot.slane %v47_v15, 1 }
  0x3a   :  { %v49_v17 = vadd.f32 %v48_v16, %v47_v15 }
  0x3c   :  { %162 = vlog2.f32 %v49_v17  ;;  %v53_v18 = vsub.f32 %v49_v17, %v161_v10 }
  0x3e   :  { %164 = vlog2.f32 %v53_v18 }
  0x46   :  { %v163_v24 = vpop.eup %162 }
  0x47   :  { %v51_v25 = vmul.f32 0.6931472, %v163_v24 }
  0x48   :  { %v165_v27 = vpop.eup %164 }
  0x49   :  { %v52_v28 = vsub.f32 %v40_v8, %v51_v25  ;;  %v55_v29 = vmul.f32 0.6931472, %v165_v27 }
  0x4b   :  { %v56_v30 = vsub.f32 %v55_v29, %v51_v25  ;;  %v57_v31 = vmul.f32 1.442695, %v52_v28  ;;  %v70_v32 = vrot.slane %v52_v28, %v69_v26 }
  0x4d   :  { %166 = vpow2.f32 %v57_v31  ;;  %v97_v34 = vrot.slane %v56_v30, %v69_v26  ;;  %v71_v35 = vcombine.high %v70_v32, %v70_v32 }
  0x4f   :  { %v98_v36 = vcombine.high %v97_v34, %v97_v34  ;;  %v78_v39 = vrot.slane %v71_v35, %v69_v26 }
  0x51   :  { %v105_v38 = vrot.slane %v98_v36, %v69_v26  ;;  %v80_v42 = vmul.f32 %v78_v39, %v31_v33 }
  0x53   :  { %v107_v41 = vmul.f32 %v105_v38, %v89_v37  ;;  %v85_v48 = vrot.slane %v80_v42, %v84_v40 }
  0x55   :  { %v112_v46 = vrot.slane %v107_v41, %v84_v40 }
  0x57   :  { %v167_v43 = vpop.eup %166 }
  0x58   :  { %v59_v44 = vsub.f32 1.0, %v167_v43  ;;  %v61_v45 = vmul.f32 %v167_v43, %v167_v43 }
  0x5a   :  { %v60_v47 = vmul.f32 %v59_v44, %v59_v44  ;;  %v88_v49 = vmul.f32 0.75, %v61_v45 }
  0x5c   :  { %v62_v50 = vmul.f32 -0.25, %v60_v47  ;;  %v114_v51 = vmul.f32 %v112_v46, %v88_v49 }
  0x5e   :  { %v87_v52 = vmul.f32 %v85_v48, %v62_v50 }
  0x60   :  { %v115_v53 = vsub.f32 %v87_v52, %v114_v51 }
  0x62   :  { %v118_v54 = vrot.slane %v115_v53, 1 }
  0x64   :  { %v121_v55 = vsel %vm120_vm1, %v118_v54, 0.0 }
  0x65   :  { %122 = vadd.xlane.f32.xlu0 %v121_v55 }
  0xf2   :  { %v123_v56 = vpop.xlane.xlu0 %122 }
  0xf3   :  { %v124_v57 = vrot.slane %v123_v56, 4 }
  0xf5   :  { %v125_v58 = vadd.f32 %v124_v57, %v123_v56 }
  0xf7   :  { %v126_v59 = vrot.slane %v125_v58, 2 }
  0xf9   :  { %v127_v60 = vadd.f32 %v126_v59, %v125_v58 }
  0xfb   :  { %v128_v61 = vrot.slane %v127_v60, 1 }
  0xfd   :  { %v129_v62 = vadd.f32 %v128_v61, %v127_v60 }
  0xff   :  { %155 = vpush %v129_v62 }
 0x130   :  { %s156_s1 = spop %155 }
 0x131   :  { %s131_s22 = smul.f32 0.0078125, %s156_s1 }
 0x133   :  { %140 = sst [smem:[#allocation6]] %s131_s22 }
 0x134   :  { %199 = shalt.err (!%p196_p10)
}
 0x135   :  { %s206_s30 = smov [#allocation6]  }
 0x136   :  { %148 = dma.smem_to_hbm %s206_s30, 16, %s251_s2, [#allocation5]  }
 0x137   :  { %202 = dma.done.wait [#allocation5], 16  }
 0x138   :  { %203 = vsyncadd [#allocation5], 4294967280 }
 0x139   :  { %152 = sfence }
 0x13a   :  { %153 = vsyncpa [#allocation4], 1 }
 0x13b   :  { %154 = vsyncpa [#allocation5], 1 }

</bundles_post_ra>
